<compile_context>
chip_gen: v5e
topology: v5e:2x2
jax: 0.10.0
libtpu: 0.0.40
codegen_flags: <defaults>
</compile_context>

<pallas_src>
import jax
import jax.numpy as jnp
from jax import lax
from jax.experimental import pallas as pl
from jax.experimental.pallas import tpu as pltpu


# ---------------------------------------------------------------------------
# Model configuration (mirrors DiffusionNetwork.__init__)
# ---------------------------------------------------------------------------
THETA_DIM = 4            # param_dim
TIME_REPR_DIM = 8        # time_encoder.input_dim

THETA_ENC_HID = 32       # theta_encoder.architecture = [32]
THETA_ENC_OUT = 16       # theta_encoder.output_dim
TIME_ENC_HID = 32        # time_encoder.architecture = [32]
TIME_ENC_OUT = 16        # time_encoder.output_dim
LATENT_HID = 64          # latent_mlp.architecture = [64]
OUT_DIM = THETA_DIM      # latent_mlp output_dim == theta_dim
# activation = ReLU, final_activation = None for all three MLPs.

H1_DIM = THETA_ENC_HID + TIME_ENC_HID     # 64 (both encoder hidden layers)
H2_DIM = LATENT_HID                       # 64 (latent hidden layer)

# Max batch tile (lanes inside the kernel). (64, 8192) f32 intermediates are
# 2 MiB; total live set stays well under the 16 MiB default scoped VMEM of v5e.
_TB_MAX = 8192


def _round_up(x, m):
    return (x + m - 1) // m * m


def _cdiv(a, b):
    return (a + b - 1) // b


# ---------------------------------------------------------------------------
# Fused Pallas kernel: full forward for one batch tile.
# Inputs are batch-major blocks; layer 1 uses NT contraction so activations
# live in batch-on-lanes layout (features on sublanes, batch on lanes).
# ---------------------------------------------------------------------------
def _diffusion_kernel(theta_ref, time_ref,
                      w1a_ref, w1b_ref, b1a_ref, b1b_ref,
                      w2a_ref, w2b_ref, b2_ref, w3t_ref, b3_ref,
                      o_ref):
    f32 = jnp.float32
    nt = (((1,), (1,)), ((), ()))   # contract on last dims: a @ b.T

    # Layer 1: theta-encoder L1 and time-encoder L1, straight off the
    # batch-major input blocks (no wrapper concat/transpose needed).
    h1_top = lax.dot_general(w1a_ref[...], theta_ref[...], nt,
                             preferred_element_type=f32)          # (32, TB)
    h1_bot = lax.dot_general(w1b_ref[...], time_ref[...], nt,
                             preferred_element_type=f32)          # (32, TB)
    h1_top = jnp.maximum(h1_top + b1a_ref[...], 0.0)
    h1_bot = jnp.maximum(h1_bot + b1b_ref[...], 0.0)

    # Layer 2: folded (encoder-L2 ∘ latent-L1), split over the two halves so
    # no in-kernel concat is needed.
    h2 = (jnp.dot(w2a_ref[...], h1_top, preferred_element_type=f32)
          + jnp.dot(w2b_ref[...], h1_bot, preferred_element_type=f32)
          + b2_ref[...])                                          # (64, TB)
    h2 = jnp.maximum(h2, 0.0)

    # Layer 3: latent output Linear -> lane-dense (4, TB) output block.
    out = jnp.dot(w3t_ref[...], h2, preferred_element_type=f32) + b3_ref[...]
    o_ref[...] = out.astype(o_ref.dtype)


# ---------------------------------------------------------------------------
# Parameter folding (exact linear identity; runs inside the jitted forward)
# ---------------------------------------------------------------------------
def _fold_params(params):
    """params: list of 6 (W[in,out], b[1,out]) pairs -> tuple of kernel weights."""
    (tw1, tb1), (tw2, tb2), (mw1, mb1), (mw2, mb2), (lw1, lb1), (lw2, lb2) = params
    f32 = jnp.float32

    # Layer 1 (transposed: out-features on rows).
    w1a = tw1.T.astype(f32)                         # (32, 4)
    w1b = mw1.T.astype(f32)                         # (32, 8)
    b1a = tb1.T.astype(f32)                         # (32, 1)
    b1b = mb1.T.astype(f32)                         # (32, 1)

    # Layer 2: fold encoder output Linears into the latent first Linear
    # (no nonlinearity in between -> exact). Split by theta/time path.
    w2a = (tw2 @ lw1[:THETA_ENC_OUT]).T.astype(f32)  # (64, 32)  theta-path cols
    w2b = (mw2 @ lw1[THETA_ENC_OUT:]).T.astype(f32)  # (64, 32)  time-path cols
    b2 = (tb2 @ lw1[:THETA_ENC_OUT]
          + mb2 @ lw1[THETA_ENC_OUT:] + lb1).T.astype(f32)        # (64, 1)

    # Layer 3.
    w3t = lw2.T.astype(f32)                          # (4, 64)
    b3 = lb2.T.astype(f32)                           # (4, 1)

    return (w1a, w1b, b1a, b1b, w2a, w2b, b2, w3t, b3)


# ---------------------------------------------------------------------------
# Forward wrapper: batch-tiled pallas_call, ragged last block, no input copies
# ---------------------------------------------------------------------------
@jax.jit
def _forward_impl(theta, time_repr, params):
    folded = _fold_params(params)

    B = theta.shape[0]
    # Tile selection: keep pad waste low, amortize per-step overhead, and give
    # >= 2 parallel grid steps when possible (v7x has 2 TensorCores).
    num_target = max(2, _cdiv(B, _TB_MAX))
    tb = max(128, _round_up(_cdiv(B, num_target), 128))
    num_tiles = _cdiv(B, tb)

    theta = theta.astype(jnp.float32)
    time_repr = time_repr.astype(jnp.float32)

    weight_specs = [pl.BlockSpec(w.shape, lambda i: (0, 0)) for w in folded]

    out_t = pl.pallas_call(
        _diffusion_kernel,
        out_shape=jax.ShapeDtypeStruct((OUT_DIM, B), jnp.float32),
        grid=(num_tiles,),
        in_specs=[
            pl.BlockSpec((tb, THETA_DIM), lambda i: (i, 0)),      # streamed
            pl.BlockSpec((tb, TIME_REPR_DIM), lambda i: (i, 0)),  # streamed
        ] + weight_specs,                                          # resident
        out_specs=pl.BlockSpec((OUT_DIM, tb), lambda i: (0, i)),   # lane-dense
        compiler_params=pltpu.CompilerParams(
            dimension_semantics=("parallel",),
            vmem_limit_bytes=32 * 1024 * 1024),
    )(theta, time_repr, *folded)

    # Output is tiny (4 floats / element); transpose back to batch-major.
    return out_t.T


def diffusion_network_forward(theta, time_repr, params):
    """theta: (B, theta_dim) [or (theta_dim,)], time_repr: (B, time_repr_dim)."""
    squeeze = theta.ndim == 1
    if squeeze:
        theta = theta[None, :]
        time_repr = time_repr[None, :]
    out = _forward_impl(theta, time_repr, params)
    return out[0] if squeeze else out


# ---------------------------------------------------------------------------
# Deterministic parameter construction (PyTorch nn.Linear-like init)
# ---------------------------------------------------------------------------
def _make_linear(key, in_dim, out_dim):
    kw, kb = jax.random.split(key)
    bound = 1.0 / jnp.sqrt(in_dim)
    w = jax.random.uniform(kw, (in_dim, out_dim), jnp.float32, -bound, bound)
    b = jax.random.uniform(kb, (1, out_dim), jnp.float32, -bound, bound)
    return w, b


def make_params(key):
    ks = jax.random.split(key, 6)
    return [
        _make_linear(ks[0], THETA_DIM, THETA_ENC_HID),                  # theta enc L1
        _make_linear(ks[1], THETA_ENC_HID, THETA_ENC_OUT),              # theta enc L2
        _make_linear(ks[2], TIME_REPR_DIM, TIME_ENC_HID),               # time enc  L1
        _make_linear(ks[3], TIME_ENC_HID, TIME_ENC_OUT),                # time enc  L2
        _make_linear(ks[4], THETA_ENC_OUT + TIME_ENC_OUT, LATENT_HID),  # latent L1
        _make_linear(ks[5], LATENT_HID, OUT_DIM),                       # latent L2
    ]


# ---------------------------------------------------------------------------
# Pure-JAX reference (unfused, matches the original PyTorch forward)
# ---------------------------------------------------------------------------
def _reference(theta, time_repr, params):
    (tw1, tb1), (tw2, tb2), (mw1, mb1), (mw2, mb2), (lw1, lb1), (lw2, lb2) = params
    te = jnp.maximum(theta @ tw1 + tb1, 0.0) @ tw2 + tb2
    me = jnp.maximum(time_repr @ mw1 + mb1, 0.0) @ mw2 + mb2
    li = jnp.concatenate([te, me], axis=1)
    return jnp.maximum(li @ lw1 + lb1, 0.0) @ lw2 + lb2


if __name__ == "__main__":
    key = jax.random.PRNGKey(0)
    k_theta, k_time, k_params = jax.random.split(key, 3)
    params = make_params(k_params)

    # Small demo shapes (as the forward implies: theta (B, 4), time_repr (B, 8)).
    batch = 2
    theta = jax.random.normal(k_theta, (batch, THETA_DIM), jnp.float32)
    time_repr = jax.random.normal(k_time, (batch, TIME_REPR_DIM), jnp.float32)

    out = jax.block_until_ready(diffusion_network_forward(theta, time_repr, params))
    ref = _reference(theta, time_repr, params)
    assert out.shape == (batch, THETA_DIM), out.shape
    assert jnp.allclose(out, ref, atol=1e-4, rtol=1e-4), (out, ref)

    # Larger batch exercising the multi-tile grid + ragged last block path.
    batch2 = 2176
    theta2 = jax.random.normal(k_theta, (batch2, THETA_DIM), jnp.float32)
    time2 = jax.random.normal(k_time, (batch2, TIME_REPR_DIM), jnp.float32)
    out2 = jax.block_until_ready(diffusion_network_forward(theta2, time2, params))
    ref2 = _reference(theta2, time2, params)
    assert out2.shape == (batch2, THETA_DIM), out2.shape
    assert jnp.allclose(out2, ref2, atol=1e-4, rtol=1e-4)

    print("KERNEL_OK")
</pallas_src>

<mosaic_0001>
module attributes {stable_mosaic.version = 11 : i64} {
  func.func @_diffusion_kernel(%arg0: i32, %arg1: memref<128x4xf32, #tpu.memory_space<vmem>>, %arg2: memref<128x8xf32, #tpu.memory_space<vmem>>, %arg3: memref<32x4xf32, #tpu.memory_space<vmem>>, %arg4: memref<32x8xf32, #tpu.memory_space<vmem>>, %arg5: memref<32x1xf32, #tpu.memory_space<vmem>>, %arg6: memref<32x1xf32, #tpu.memory_space<vmem>>, %arg7: memref<64x32xf32, #tpu.memory_space<vmem>>, %arg8: memref<64x32xf32, #tpu.memory_space<vmem>>, %arg9: memref<64x1xf32, #tpu.memory_space<vmem>>, %arg10: memref<4x64xf32, #tpu.memory_space<vmem>>, %arg11: memref<4x1xf32, #tpu.memory_space<vmem>>, %arg12: memref<4x128xf32, #tpu.memory_space<vmem>>) attributes {dimension_semantics = [#tpu.dimension_semantics<parallel>], iteration_bounds = array<i64: 1>, scalar_prefetch = 0 : i64, scratch_operands = 0 : i64, tpu.core_type = #tpu.core_type<tc>, window_params = [{transform_indices = @transform_0, window_bounds = array<i64: 128, 4>}, {transform_indices = @transform_1, window_bounds = array<i64: 128, 8>}, {pipeline_mode = #tpu.pipeline_mode<synchronous>, transform_indices = @transform_2, window_bounds = array<i64: 32, 4>}, {pipeline_mode = #tpu.pipeline_mode<synchronous>, transform_indices = @transform_3, window_bounds = array<i64: 32, 8>}, {pipeline_mode = #tpu.pipeline_mode<synchronous>, transform_indices = @transform_4, window_bounds = array<i64: 32, 1>}, {pipeline_mode = #tpu.pipeline_mode<synchronous>, transform_indices = @transform_5, window_bounds = array<i64: 32, 1>}, {pipeline_mode = #tpu.pipeline_mode<synchronous>, transform_indices = @transform_6, window_bounds = array<i64: 64, 32>}, {pipeline_mode = #tpu.pipeline_mode<synchronous>, transform_indices = @transform_7, window_bounds = array<i64: 64, 32>}, {pipeline_mode = #tpu.pipeline_mode<synchronous>, transform_indices = @transform_8, window_bounds = array<i64: 64, 1>}, {pipeline_mode = #tpu.pipeline_mode<synchronous>, transform_indices = @transform_9, window_bounds = array<i64: 4, 64>}, {pipeline_mode = #tpu.pipeline_mode<synchronous>, transform_indices = @transform_10, window_bounds = array<i64: 4, 1>}, {transform_indices = @transform_11, window_bounds = array<i64: 4, 128>}]} {
    %c0 = arith.constant 0 : index
    %c0_0 = arith.constant 0 : index
    %0 = vector.load %arg3[%c0, %c0_0] : memref<32x4xf32, #tpu.memory_space<vmem>>, vector<32x4xf32>
    %c0_1 = arith.constant 0 : index
    %c0_2 = arith.constant 0 : index
    %1 = vector.load %arg1[%c0_1, %c0_2] : memref<128x4xf32, #tpu.memory_space<vmem>>, vector<128x4xf32>
    %cst = arith.constant dense<0.000000e+00> : vector<32x128xf32>
    %2 = tpu.matmul %0, %1, %cst {dimension_numbers = #tpu.dot_dimension_numbers<[1], [1], [0], [0], [0, 0, 1, 0], [], []>} : vector<32x4xf32>, vector<128x4xf32>, vector<32x128xf32> -> vector<32x128xf32>
    %c0_3 = arith.constant 0 : index
    %c0_4 = arith.constant 0 : index
    %3 = vector.load %arg4[%c0_3, %c0_4] : memref<32x8xf32, #tpu.memory_space<vmem>>, vector<32x8xf32>
    %c0_5 = arith.constant 0 : index
    %c0_6 = arith.constant 0 : index
    %4 = vector.load %arg2[%c0_5, %c0_6] : memref<128x8xf32, #tpu.memory_space<vmem>>, vector<128x8xf32>
    %cst_7 = arith.constant dense<0.000000e+00> : vector<32x128xf32>
    %5 = tpu.matmul %3, %4, %cst_7 {dimension_numbers = #tpu.dot_dimension_numbers<[1], [1], [0], [0], [0, 0, 1, 0], [], []>} : vector<32x8xf32>, vector<128x8xf32>, vector<32x128xf32> -> vector<32x128xf32>
    %c0_8 = arith.constant 0 : index
    %c0_9 = arith.constant 0 : index
    %6 = vector.load %arg5[%c0_8, %c0_9] : memref<32x1xf32, #tpu.memory_space<vmem>>, vector<32x1xf32>
    %7 = vector.broadcast %6 : vector<32x1xf32> to vector<32x128xf32>
    %8 = arith.addf %2, %7 : vector<32x128xf32>
    %cst_10 = arith.constant 0.000000e+00 : f32
    %9 = vector.broadcast %cst_10 : f32 to vector<32x128xf32>
    %10 = arith.maximumf %8, %9 : vector<32x128xf32>
    %c0_11 = arith.constant 0 : index
    %c0_12 = arith.constant 0 : index
    %11 = vector.load %arg6[%c0_11, %c0_12] : memref<32x1xf32, #tpu.memory_space<vmem>>, vector<32x1xf32>
    %12 = vector.broadcast %11 : vector<32x1xf32> to vector<32x128xf32>
    %13 = arith.addf %5, %12 : vector<32x128xf32>
    %cst_13 = arith.constant 0.000000e+00 : f32
    %14 = vector.broadcast %cst_13 : f32 to vector<32x128xf32>
    %15 = arith.maximumf %13, %14 : vector<32x128xf32>
    %c0_14 = arith.constant 0 : index
    %c0_15 = arith.constant 0 : index
    %16 = vector.load %arg7[%c0_14, %c0_15] : memref<64x32xf32, #tpu.memory_space<vmem>>, vector<64x32xf32>
    %cst_16 = arith.constant dense<0.000000e+00> : vector<64x128xf32>
    %17 = tpu.matmul %16, %10, %cst_16 {dimension_numbers = #tpu.dot_dimension_numbers<[1], [0], [0], [1], [0, 0, 1, 1], [], []>} : vector<64x32xf32>, vector<32x128xf32>, vector<64x128xf32> -> vector<64x128xf32>
    %c0_17 = arith.constant 0 : index
    %c0_18 = arith.constant 0 : index
    %18 = vector.load %arg8[%c0_17, %c0_18] : memref<64x32xf32, #tpu.memory_space<vmem>>, vector<64x32xf32>
    %cst_19 = arith.constant dense<0.000000e+00> : vector<64x128xf32>
    %19 = tpu.matmul %18, %15, %cst_19 {dimension_numbers = #tpu.dot_dimension_numbers<[1], [0], [0], [1], [0, 0, 1, 1], [], []>} : vector<64x32xf32>, vector<32x128xf32>, vector<64x128xf32> -> vector<64x128xf32>
    %20 = arith.addf %17, %19 : vector<64x128xf32>
    %c0_20 = arith.constant 0 : index
    %c0_21 = arith.constant 0 : index
    %21 = vector.load %arg9[%c0_20, %c0_21] : memref<64x1xf32, #tpu.memory_space<vmem>>, vector<64x1xf32>
    %22 = vector.broadcast %21 : vector<64x1xf32> to vector<64x128xf32>
    %23 = arith.addf %20, %22 : vector<64x128xf32>
    %cst_22 = arith.constant 0.000000e+00 : f32
    %24 = vector.broadcast %cst_22 : f32 to vector<64x128xf32>
    %25 = arith.maximumf %23, %24 : vector<64x128xf32>
    %c0_23 = arith.constant 0 : index
    %c0_24 = arith.constant 0 : index
    %26 = vector.load %arg10[%c0_23, %c0_24] : memref<4x64xf32, #tpu.memory_space<vmem>>, vector<4x64xf32>
    %cst_25 = arith.constant dense<0.000000e+00> : vector<4x128xf32>
    %27 = tpu.matmul %26, %25, %cst_25 {dimension_numbers = #tpu.dot_dimension_numbers<[1], [0], [0], [1], [0, 0, 1, 1], [], []>} : vector<4x64xf32>, vector<64x128xf32>, vector<4x128xf32> -> vector<4x128xf32>
    %c0_26 = arith.constant 0 : index
    %c0_27 = arith.constant 0 : index
    %28 = vector.load %arg11[%c0_26, %c0_27] : memref<4x1xf32, #tpu.memory_space<vmem>>, vector<4x1xf32>
    %29 = vector.broadcast %28 : vector<4x1xf32> to vector<4x128xf32>
    %30 = arith.addf %27, %29 : vector<4x128xf32>
    %c0_28 = arith.constant 0 : index
    %c0_29 = arith.constant 0 : index
    %31 = vector.load %arg12[%c0_28, %c0_29] : memref<4x128xf32, #tpu.memory_space<vmem>>, vector<4x128xf32>
    tpu.vector_store %arg12[%c0_28, %c0_29], %30 {strides = array<i32>} : memref<4x128xf32, #tpu.memory_space<vmem>>, vector<4x128xf32>,
    return
  }
  func.func @transform_0(%arg0: i32) -> (i32, i32) {
    %c0_i32 = arith.constant 0 : i32
    %c0_i32_0 = arith.constant 0 : i32
    return %arg0, %c0_i32 : i32, i32
  }
  func.func @transform_1(%arg0: i32) -> (i32, i32) {
    %c0_i32 = arith.constant 0 : i32
    %c0_i32_0 = arith.constant 0 : i32
    return %arg0, %c0_i32 : i32, i32
  }
  func.func @transform_2(%arg0: i32) -> (i32, i32) {
    %c0_i32 = arith.constant 0 : i32
    %c0_i32_0 = arith.constant 0 : i32
    %c0_i32_1 = arith.constant 0 : i32
    return %c0_i32, %c0_i32_0 : i32, i32
  }
  func.func @transform_3(%arg0: i32) -> (i32, i32) {
    %c0_i32 = arith.constant 0 : i32
    %c0_i32_0 = arith.constant 0 : i32
    %c0_i32_1 = arith.constant 0 : i32
    return %c0_i32, %c0_i32_0 : i32, i32
  }
  func.func @transform_4(%arg0: i32) -> (i32, i32) {
    %c0_i32 = arith.constant 0 : i32
    %c0_i32_0 = arith.constant 0 : i32
    %c0_i32_1 = arith.constant 0 : i32
    return %c0_i32, %c0_i32_0 : i32, i32
  }
  func.func @transform_5(%arg0: i32) -> (i32, i32) {
    %c0_i32 = arith.constant 0 : i32
    %c0_i32_0 = arith.constant 0 : i32
    %c0_i32_1 = arith.constant 0 : i32
    return %c0_i32, %c0_i32_0 : i32, i32
  }
  func.func @transform_6(%arg0: i32) -> (i32, i32) {
    %c0_i32 = arith.constant 0 : i32
    %c0_i32_0 = arith.constant 0 : i32
    %c0_i32_1 = arith.constant 0 : i32
    return %c0_i32, %c0_i32_0 : i32, i32
  }
  func.func @transform_7(%arg0: i32) -> (i32, i32) {
    %c0_i32 = arith.constant 0 : i32
    %c0_i32_0 = arith.constant 0 : i32
    %c0_i32_1 = arith.constant 0 : i32
    return %c0_i32, %c0_i32_0 : i32, i32
  }
  func.func @transform_8(%arg0: i32) -> (i32, i32) {
    %c0_i32 = arith.constant 0 : i32
    %c0_i32_0 = arith.constant 0 : i32
    %c0_i32_1 = arith.constant 0 : i32
    return %c0_i32, %c0_i32_0 : i32, i32
  }
  func.func @transform_9(%arg0: i32) -> (i32, i32) {
    %c0_i32 = arith.constant 0 : i32
    %c0_i32_0 = arith.constant 0 : i32
    %c0_i32_1 = arith.constant 0 : i32
    return %c0_i32, %c0_i32_0 : i32, i32
  }
  func.func @transform_10(%arg0: i32) -> (i32, i32) {
    %c0_i32 = arith.constant 0 : i32
    %c0_i32_0 = arith.constant 0 : i32
    %c0_i32_1 = arith.constant 0 : i32
    return %c0_i32, %c0_i32_0 : i32, i32
  }
  func.func @transform_11(%arg0: i32) -> (i32, i32) {
    %c0_i32 = arith.constant 0 : i32
    %c0_i32_0 = arith.constant 0 : i32
    return %c0_i32, %arg0 : i32, i32
  }
}

</mosaic_0001>

<bundles_post_ra>
// kernel: _forward_impl.1
= control target key start
LH: loop header
LB: loop body
LE: loop exit
PB: predicated region body
PF: predicated region fallthrough
CT: control target
= control target key end

     0   :  { %vm102_vm0 = vcmask 31744   ;;  %vm220_vm1 = vcmask 64512   ;;  %v622_v12 = vmov 0   ;;  %vm330_vm2 = vcmask 261120   ;;  %s964_s0 = inlined_call_operand.vmem [shape: f32[2,4], index: 0, kind: input, shape index: {}]   ;;  %s965_s1 = inlined_call_operand.vmem [shape: f32[2,8], index: 1, kind: input, shape index: {}]   ;;  %s966_s4 = inlined_call_operand.vmem [shape: f32[32,1], index: 4, kind: input, shape index: {}]   ;;  %s967_s5 = inlined_call_operand.vmem [shape: f32[32,1], index: 5, kind: input, shape index: {}]   ;;  %s968_s8 = inlined_call_operand.vmem [shape: f32[64,1], index: 8, kind: input, shape index: {}]   ;;  %s969_s10 = inlined_call_operand.vmem [shape: f32[4,1], index: 10, kind: input, shape index: {}]   ;;  %s970_s2 = inlined_call_operand.vmem [shape: f32[32,4], index: 2, kind: input, shape index: {}]   ;;  %s971_s3 = inlined_call_operand.vmem [shape: f32[32,8], index: 3, kind: input, shape index: {}]   ;;  %s972_s7 = inlined_call_operand.vmem [shape: f32[64,32], index: 7, kind: input, shape index: {}]   ;;  %s973_s6 = inlined_call_operand.vmem [shape: f32[64,32], index: 6, kind: input, shape index: {}]   ;;  %s974_s9 = inlined_call_operand.vmem [shape: f32[4,64], index: 9, kind: input, shape index: {}]   ;;  %s975_s11 = inlined_call_operand.vmem [shape: f32[4,2], index: 11, kind: output, shape index: {}]  }
   0x1   :  { %v57_v0 = vld [vmem:[%s964_s0 + $0x78] sm:$0xff]  ;;  %v56_v2 = vld [vmem:[%s964_s0 + $0x70] sm:$0xff]  ;;  %v55_v4 = vld [vmem:[%s964_s0 + $0x68] sm:$0xff]  ;;  %620 = vset.pattern.permute.xlu1 %v622_v12  ;;  %619 = vset.pattern.permute.xlu0 %v622_v12  ;;  %vm532_vm3 = vcmask 523264  }
   0x2   :  { %v77_v1 = vld [vmem:[%s965_s1 + $0x78] sm:$0xff]  ;;  %561 = vmatpush.xpose.msk.msra.mxu0 %vm102_vm0, %v57_v0  ;;  %v76_v3 = vld [vmem:[%s965_s1 + $0x70] sm:$0xff]  ;;  %v75_v5 = vld [vmem:[%s965_s1 + $0x68] sm:$0xff]  ;;  %621 = vset.pattern.permute.xlu2 %v622_v12 }
   0x3   :  { %581 = vmatpush.xpose.msk.msra.mxu1 %vm220_vm1, %v77_v1  ;;  %v54_v6 = vld [vmem:[%s964_s0 + $0x60] sm:$0xff]  ;;  %v81_v8 = vld [vmem:[%s966_s4 + $0x18] sm:$0xff]  ;;  %v80_v9 = vld [vmem:[%s966_s4 + $0x10] sm:$0xff] }
   0x4   :  { %v74_v7 = vld [vmem:[%s965_s1 + $0x60] sm:$0xff]  ;;  %v53_v10 = vld [vmem:[%s964_s0 + $0x58] sm:$0xff]  ;;  %99 = vperm.xlu0 %619, %v81_v8   ;;  %94 = vperm.xlu1 %620, %v80_v9   ;;  %v52_v13 = vld [vmem:[%s964_s0 + $0x50] sm:$0xff] }
   0x5   :  { %v73_v11 = vld [vmem:[%s965_s1 + $0x58] sm:$0xff]  ;;  %v72_v14 = vld [vmem:[%s965_s1 + $0x50] sm:$0xff]  ;;  %v51_v17 = vld [vmem:[%s964_s0 + $0x48] sm:$0xff] }
   0x6   :  { %562 = vmatpush.xpose.msk.msra.mxu0 %vm102_vm0, %v56_v2  ;;  %v199_v15 = vld [vmem:[%s967_s5 + $0x18] sm:$0xff]  ;;  %v198_v16 = vld [vmem:[%s967_s5 + $0x10] sm:$0xff]  ;;  %v71_v18 = vld [vmem:[%s965_s1 + $0x48] sm:$0xff] }
   0x7   :  { %582 = vmatpush.xpose.msk.msra.mxu1 %vm220_vm1, %v76_v3  ;;  %v50_v19 = vld [vmem:[%s964_s0 + $0x40] sm:$0xff]  ;;  %v49_v21 = vld [vmem:[%s964_s0 + $0x38] sm:$0xff]  ;;  %v48_v25 = vld [vmem:[%s964_s0 + $0x30] sm:$0xff] }
   0x8   :  { %v70_v20 = vld [vmem:[%s965_s1 + $0x40] sm:$0xff]  ;;  %v69_v22 = vld [vmem:[%s965_s1 + $0x38] sm:$0xff]  ;;  %v68_v26 = vld [vmem:[%s965_s1 + $0x30] sm:$0xff] }
   0x9   :  { %v196_v23 = vld [vmem:[%s967_s5] sm:$0xff]  ;;  %v47_v27 = vld [vmem:[%s964_s0 + $0x28] sm:$0xff]  ;;  %v467_v30 = vld [vmem:[%s968_s8 + $0x30] sm:$0xff] }
   0xa   :  { %563 = vmatpush.xpose.msk.msra.mxu0 %vm102_vm0, %v55_v4  ;;  %v78_v24 = vld [vmem:[%s966_s4] sm:$0xff]  ;;  %v67_v28 = vld [vmem:[%s965_s1 + $0x28] sm:$0xff]  ;;  %v45_v33 = vld [vmem:[%s964_s0 + $0x18] sm:$0xff] }
   0xb   :  { %583 = vmatpush.xpose.msk.msra.mxu1 %vm220_vm1, %v75_v5  ;;  %v466_v29 = vld [vmem:[%s968_s8 + $0x28] sm:$0xff]  ;;  %v46_v31 = vld [vmem:[%s964_s0 + $0x20] sm:$0xff]  ;;  %v65_v34 = vld [vmem:[%s965_s1 + $0x18] sm:$0xff] }
   0xc   :  { %217 = vperm.xlu0 %619, %v199_v15   ;;  %212 = vperm.xlu1 %620, %v198_v16   ;;  %v66_v32 = vld [vmem:[%s965_s1 + $0x20] sm:$0xff]  ;;  %v463_v35 = vld [vmem:[%s968_s8 + $0x10] sm:$0xff]  ;;  %v464_v36 = vld [vmem:[%s968_s8 + $0x18] sm:$0xff] }
   0xd   :  { %v79_v37 = vld [vmem:[%s966_s4 + $0x8] sm:$0xff]  ;;  %v44_v38 = vld [vmem:[%s964_s0 + $0x10] sm:$0xff]  ;;  %v526_v42 = vld [vmem:[%s969_s10] sm:$0xf] }
   0xe   :  { %564 = vmatpush.xpose.msk.msra.mxu0 %vm102_vm0, %v54_v6  ;;  %v64_v39 = vld [vmem:[%s965_s1 + $0x10] sm:$0xff]  ;;  %89 = vperm.xlu2 %621, %v79_v37   ;;  %v43_v40 = vld [vmem:[%s964_s0 + $0x8] sm:$0xff]  ;;  %v461_v43 = vld [vmem:[%s968_s8] sm:$0xff] }
   0xf   :  { %584 = vmatpush.xpose.msk.msra.mxu1 %vm220_vm1, %v74_v7  ;;  %v63_v41 = vld [vmem:[%s965_s1 + $0x8] sm:$0xff]  ;;  %v42_v45 = vld [vmem:[%s964_s0] sm:$0xff]  ;;  %v468_v49 = vld [vmem:[%s968_s8 + $0x38] sm:$0xff] }
  0x10   :  { %v197_v44 = vld [vmem:[%s967_s5 + $0x8] sm:$0xff]  ;;  %v62_v46 = vld [vmem:[%s965_s1] sm:$0xff]  ;;  %v40_v53 = vld [vmem:[%s970_s2 + $0x10] sm:$0xff] }
  0x11   :  { %v38_v47 = vld [vmem:[%s970_s2] sm:$0xff]  ;;  %v39_v50 = vld [vmem:[%s970_s2 + $0x8] sm:$0xff]  ;;  %v60_v54 = vld [vmem:[%s971_s3 + $0x10] sm:$0xff] }
  0x12   :  { %565 = vmatpush.xpose.msk.msra.mxu0 %vm102_vm0, %v53_v10  ;;  %v58_v48 = vld [vmem:[%s971_s3] sm:$0xff]  ;;  %v59_v51 = vld [vmem:[%s971_s3 + $0x8] sm:$0xff]  ;;  %v41_v56 = vld [vmem:[%s970_s2 + $0x18] sm:$0xff] }
  0x13   :  { %585 = vmatpush.xpose.msk.msra.mxu1 %vm220_vm1, %v73_v11  ;;  %v465_v52 = vld [vmem:[%s968_s8 + $0x20] sm:$0xff]  ;;  %v462_v55 = vld [vmem:[%s968_s8 + $0x8] sm:$0xff]  ;;  %v61_v57 = vld [vmem:[%s971_s3 + $0x18] sm:$0xff] }
  0x14   :  { %202 = vperm.xlu1 %620, %v196_v23   ;;  %84 = vperm.xlu0 %619, %v78_v24   ;;  %v319_v37 = vld [vmem:[%s973_s6 + $0x28] sm:$0xff] }
  0x16   :  { %566 = vmatpush.xpose.msk.msra.mxu0 %vm102_vm0, %v52_v13  ;;  %207 = vperm.xlu2 %621, %v197_v44  }
  0x17   :  { %586 = vmatpush.xpose.msk.msra.mxu1 %vm220_vm1, %v72_v14 }
  0x1a   :  { %567 = vmatpush.xpose.msk.msra.mxu0 %vm102_vm0, %v51_v17 }
  0x1b   :  { %587 = vmatpush.xpose.msk.msra.mxu1 %vm220_vm1, %v71_v18 }
  0x1c   :  { %496 = vperm.xlu1 %620, %v466_v29   ;;  %501 = vperm.xlu0 %619, %v467_v30   ;;  %v315_v29 = vld [vmem:[%s973_s6 + $0x8] sm:$0xff]  ;;  %v324_v30 = vld [vmem:[%s972_s7 + $0x10] sm:$0xff] }
  0x1e   :  { %568 = vmatpush.xpose.msk.msra.mxu0 %vm102_vm0, %v50_v19  ;;  %506 = vperm.xlu2 %621, %v468_v49  }
  0x1f   :  { %588 = vmatpush.xpose.msk.msra.mxu1 %vm220_vm1, %v70_v20 }
  0x22   :  { %569 = vmatpush.xpose.msk.msra.mxu0 %vm102_vm0, %v49_v21 }
  0x23   :  { %589 = vmatpush.xpose.msk.msra.mxu1 %vm220_vm1, %v69_v22 }
  0x24   :  { %481 = vperm.xlu1 %620, %v463_v35   ;;  %486 = vperm.xlu0 %619, %v464_v36   ;;  %v318_v35 = vld [vmem:[%s973_s6 + $0x20] sm:$0xff]  ;;  %v327_v36 = vld [vmem:[%s972_s7 + $0x28] sm:$0xff] }
  0x26   :  { %570 = vmatpush.xpose.msk.msra.mxu0 %vm102_vm0, %v48_v25  ;;  %491 = vperm.xlu2 %621, %v465_v52  }
  0x27   :  { %590 = vmatpush.xpose.msk.msra.mxu1 %vm220_vm1, %v68_v26  ;;  %v322_v26 = vld [vmem:[%s972_s7] sm:$0xff] }
  0x2a   :  { %571 = vmatpush.xpose.msk.msra.mxu0 %vm102_vm0, %v47_v27  ;;  %v314_v27 = vld [vmem:[%s973_s6] sm:$0xff] }
  0x2b   :  { %591 = vmatpush.xpose.msk.msra.mxu1 %vm220_vm1, %v67_v28  ;;  %v323_v28 = vld [vmem:[%s972_s7 + $0x8] sm:$0xff] }
  0x2c   :  { %529 = vperm.xlu1 %620, %v526_v42   ;;  %471 = vperm.xlu0 %619, %v461_v43  }
  0x2e   :  { %572 = vmatpush.xpose.msk.msra.mxu0 %vm102_vm0, %v46_v31  ;;  %476 = vperm.xlu2 %621, %v462_v55   ;;  %v316_v31 = vld [vmem:[%s973_s6 + $0x10] sm:$0xff] }
  0x2f   :  { %592 = vmatpush.xpose.msk.msra.mxu1 %vm220_vm1, %v66_v32  ;;  %v325_v32 = vld [vmem:[%s972_s7 + $0x18] sm:$0xff] }
  0x32   :  { %573 = vmatpush.xpose.msk.msra.mxu0 %vm102_vm0, %v45_v33  ;;  %v317_v33 = vld [vmem:[%s973_s6 + $0x18] sm:$0xff] }
  0x33   :  { %593 = vmatpush.xpose.msk.msra.mxu1 %vm220_vm1, %v65_v34  ;;  %v326_v34 = vld [vmem:[%s972_s7 + $0x20] sm:$0xff] }
  0x36   :  { %574 = vmatpush.xpose.msk.msra.mxu0 %vm102_vm0, %v44_v38  ;;  %v328_v38 = vld [vmem:[%s972_s7 + $0x30] sm:$0xff] }
  0x37   :  { %594 = vmatpush.xpose.msk.msra.mxu1 %vm220_vm1, %v64_v39  ;;  %v320_v39 = vld [vmem:[%s973_s6 + $0x30] sm:$0xff] }
  0x3a   :  { %575 = vmatpush.xpose.msk.msra.mxu0 %vm102_vm0, %v43_v40  ;;  %v329_v40 = vld [vmem:[%s972_s7 + $0x38] sm:$0xff] }
  0x3b   :  { %595 = vmatpush.xpose.msk.msra.mxu1 %vm220_vm1, %v63_v41  ;;  %v321_v41 = vld [vmem:[%s973_s6 + $0x38] sm:$0xff] }
  0x3e   :  { %576 = vmatpush.xpose.msk.msra.mxu0 %vm102_vm0, %v42_v45 }
  0x3f   :  { %596 = vmatpush.xpose.msk.msra.mxu1 %vm220_vm1, %v62_v46 }
  0x41   :  { %577 = vmatmul.msk.f32.vlgmr.msra.gmra.mxu0 %vm102_vm0, %v38_v47 }
  0x42   :  { %597 = vmatmul.msk.f32.vlgmr.msra.gmra.mxu1 %vm220_vm1, %v58_v48 }
  0x49   :  { %578 = vmatmul.msk.f32.gmra.mxu0 %vm102_vm0, %v39_v50 }
  0x4a   :  { %598 = vmatmul.msk.f32.gmra.mxu1 %vm220_vm1, %v59_v51 }
  0x51   :  { %579 = vmatmul.msk.f32.gmra.mxu0 %vm102_vm0, %v40_v53 }
  0x52   :  { %599 = vmatmul.msk.f32.gmra.mxu1 %vm220_vm1, %v60_v54 }
  0x59   :  { %580 = vmatmul.msk.f32.gmra.mxu0 %vm102_vm0, %v41_v56 }
  0x5a   :  { %600 = vmatmul.msk.f32.gmra.mxu1 %vm220_vm1, %v61_v57 }
  0x68   :  { %v90_v0 = vpop.permute.xlu2 %89 }
  0x70   :  { %v208_v11 = vpop.permute.xlu2 %207 }
  0x76   :  { %v100_v60 = vpop.permute.xlu0 %99  ;;  %v95_v61 = vpop.permute.xlu1 %94 }
  0x78   :  { %v507_v55 = vpop.permute.xlu2 %506 }
  0x7e   :  { %v218_v3 = vpop.permute.xlu0 %217  ;;  %v213_v4 = vpop.permute.xlu1 %212 }
  0x86   :  { %v203_v16 = vpop.permute.xlu1 %202  ;;  %v85_v17 = vpop.permute.xlu0 %84 }
  0xbe   :  { %v180_v58 = vpop.f32.mrf.mxu0 }
  0xbf   :  { %v298_v59 = vpop.f32.mrf.mxu1  ;;  %v181_v18 = vadd.f32 %v180_v58, %v85_v17  ;;  %v502_v58 = vpop.permute.xlu0 %501 }
  0xc0   :  { %v299_v19 = vadd.f32 %v298_v59, %v203_v16  ;;  %v497_v59 = vpop.permute.xlu1 %496 }
  0xc1   :  { %v192_v24 = vmax.f32 %v181_v18, 0.0 }
  0xc2   :  { %v310_v25 = vmax.f32 %v299_v19, 0.0 }
  0xc6   :  { %v183_v62 = vpop.f32.mrf.mxu0 }
  0xc7   :  { %v301_v63 = vpop.f32.mrf.mxu1  ;;  %v184_v12 = vadd.f32 %v183_v62, %v90_v0 }
  0xc8   :  { %v302_v13 = vadd.f32 %v301_v63, %v208_v11 }
  0xc9   :  { %v193_v22 = vmax.f32 %v184_v12, 0.0 }
  0xca   :  { %v311_v23 = vmax.f32 %v302_v13, 0.0 }
  0xce   :  { %v186_v1 = vpop.f32.mrf.mxu0 }
  0xcf   :  { %v304_v2 = vpop.f32.mrf.mxu1  ;;  %v187_v7 = vadd.f32 %v186_v1, %v95_v61  ;;  %v492_v1 = vpop.permute.xlu2 %491 }
  0xd0   :  { %v305_v8 = vadd.f32 %v304_v2, %v213_v4 }
  0xd1   :  { %v194_v20 = vmax.f32 %v187_v7, 0.0 }
  0xd2   :  { %v312_v21 = vmax.f32 %v305_v8, 0.0 }
  0xd6   :  { %v189_v5 = vpop.f32.mrf.mxu0 }
  0xd7   :  { %v307_v6 = vpop.f32.mrf.mxu1  ;;  %v190_v10 = vadd.f32 %v189_v5, %v100_v60  ;;  %v487_v5 = vpop.permute.xlu0 %486 }
  0xd8   :  { %v308_v9 = vadd.f32 %v307_v6, %v218_v3  ;;  %v477_v18 = vpop.permute.xlu2 %476 }
  0xd9   :  { %v195_v15 = vmax.f32 %v190_v10, 0.0 }
  0xda   :  { %v313_v14 = vmax.f32 %v308_v9, 0.0 }
  0xdb   :  { %432 = vmatpush.msra.mxu3 %v195_v15  ;;  %v482_v15 = vpop.permute.xlu1 %481 }
  0xdc   :  { %367 = vmatpush.msra.mxu2 %v313_v14 }
  0xdd   :  { %433 = vmatpush.msra.mxu3 %v194_v20 }
  0xde   :  { %368 = vmatpush.msra.mxu2 %v312_v21 }
  0xdf   :  { %434 = vmatpush.msra.mxu3 %v193_v22  ;;  %v472_v21 = vpop.permute.xlu0 %471 }
  0xe0   :  { %369 = vmatpush.msra.mxu2 %v311_v23 }
  0xe1   :  { %435 = vmatpush.msra.mxu3 %v192_v24 }
  0xe2   :  { %370 = vmatpush.msra.mxu2 %v310_v25  ;;  %609 = vmatmul.msk.f32.vlgmr.msra.gmra.mxu3 %vm330_vm2, %v314_v27 }
  0xe3   :  { %601 = vmatmul.msk.f32.vlgmr.msra.gmra.mxu2 %vm330_vm2, %v322_v26  ;;  %v525_v26 = vld [vmem:[%s974_s9] sm:$0xf]  ;;  %v530_v27 = vpop.permute.xlu1 %529 }
  0xea   :  { %610 = vmatmul.msk.f32.gmra.mxu3 %vm330_vm2, %v315_v29 }
  0xeb   :  { %602 = vmatmul.msk.f32.gmra.mxu2 %vm330_vm2, %v323_v28 }
  0xf2   :  { %611 = vmatmul.msk.f32.gmra.mxu3 %vm330_vm2, %v316_v31 }
  0xf3   :  { %603 = vmatmul.msk.f32.gmra.mxu2 %vm330_vm2, %v324_v30 }
  0xfa   :  { %612 = vmatmul.msk.f32.gmra.mxu3 %vm330_vm2, %v317_v33 }
  0xfb   :  { %604 = vmatmul.msk.f32.gmra.mxu2 %vm330_vm2, %v325_v32 }
 0x102   :  { %613 = vmatmul.msk.f32.gmra.mxu3 %vm330_vm2, %v318_v35 }
 0x103   :  { %605 = vmatmul.msk.f32.gmra.mxu2 %vm330_vm2, %v326_v34 }
 0x10a   :  { %614 = vmatmul.msk.f32.gmra.mxu3 %vm330_vm2, %v319_v37 }
 0x10b   :  { %606 = vmatmul.msk.f32.gmra.mxu2 %vm330_vm2, %v327_v36 }
 0x112   :  { %615 = vmatmul.msk.f32.gmra.mxu3 %vm330_vm2, %v320_v39 }
 0x113   :  { %607 = vmatmul.msk.f32.gmra.mxu2 %vm330_vm2, %v328_v38 }
 0x11a   :  { %616 = vmatmul.msk.f32.gmra.mxu3 %vm330_vm2, %v321_v41 }
 0x11b   :  { %608 = vmatmul.msk.f32.gmra.mxu2 %vm330_vm2, %v329_v40 }
 0x165   :  { %v437_v43 = vpop.f32.mrf.mxu3 }
 0x166   :  { %v372_v42 = vpop.f32.mrf.mxu2 }
 0x167   :  { %v438_v44 = vadd.f32 %v437_v43, %v372_v42 }
 0x169   :  { %v509_v23 = vadd.f32 %v472_v21, %v438_v44 }
 0x16b   :  { %v517_v25 = vmax.f32 %v509_v23, 0.0 }
 0x16d   :  { %v440_v46 = vpop.f32.mrf.mxu3 }
 0x16e   :  { %v375_v45 = vpop.f32.mrf.mxu2 }
 0x16f   :  { %v441_v12 = vadd.f32 %v440_v46, %v375_v45 }
 0x171   :  { %v510_v20 = vadd.f32 %v477_v18, %v441_v12 }
 0x173   :  { %v518_v24 = vmax.f32 %v510_v20, 0.0 }
 0x175   :  { %v443_v48 = vpop.f32.mrf.mxu3 }
 0x176   :  { %v378_v47 = vpop.f32.mrf.mxu2 }
 0x177   :  { %v444_v9 = vadd.f32 %v443_v48, %v378_v47 }
 0x179   :  { %v511_v17 = vadd.f32 %v482_v15, %v444_v9 }
 0x17b   :  { %v519_v22 = vmax.f32 %v511_v17, 0.0 }
 0x17d   :  { %v446_v50 = vpop.f32.mrf.mxu3 }
 0x17e   :  { %v381_v49 = vpop.f32.mrf.mxu2 }
 0x17f   :  { %v447_v6 = vadd.f32 %v446_v50, %v381_v49 }
 0x181   :  { %v512_v14 = vadd.f32 %v487_v5, %v447_v6 }
 0x183   :  { %v520_v19 = vmax.f32 %v512_v14, 0.0 }
 0x185   :  { %v449_v52 = vpop.f32.mrf.mxu3 }
 0x186   :  { %v384_v51 = vpop.f32.mrf.mxu2 }
 0x187   :  { %v450_v2 = vadd.f32 %v449_v52, %v384_v51 }
 0x189   :  { %v513_v11 = vadd.f32 %v492_v1, %v450_v2 }
 0x18b   :  { %v521_v16 = vmax.f32 %v513_v11, 0.0 }
 0x18d   :  { %v452_v54 = vpop.f32.mrf.mxu3 }
 0x18e   :  { %v387_v53 = vpop.f32.mrf.mxu2 }
 0x18f   :  { %v453_v63 = vadd.f32 %v452_v54, %v387_v53 }
 0x191   :  { %v514_v8 = vadd.f32 %v497_v59, %v453_v63 }
 0x193   :  { %v522_v13 = vmax.f32 %v514_v8, 0.0 }
 0x195   :  { %v455_v57 = vpop.f32.mrf.mxu3 }
 0x196   :  { %v390_v56 = vpop.f32.mrf.mxu2 }
 0x197   :  { %v456_v60 = vadd.f32 %v455_v57, %v390_v56 }
 0x199   :  { %v515_v4 = vadd.f32 %v502_v58, %v456_v60 }
 0x19b   :  { %v523_v10 = vmax.f32 %v515_v4, 0.0 }
 0x19d   :  { %v458_v62 = vpop.f32.mrf.mxu3 }
 0x19e   :  { %v393_v61 = vpop.f32.mrf.mxu2 }
 0x19f   :  { %v459_v0 = vadd.f32 %v458_v62, %v393_v61 }
 0x1a1   :  { %v516_v3 = vadd.f32 %v507_v55, %v459_v0 }
 0x1a3   :  { %v524_v7 = vmax.f32 %v516_v3, 0.0 }
 0x1a5   :  { %544 = vmatpush.msrb.mxu2 %v524_v7 }
 0x1a7   :  { %545 = vmatpush.msrb.mxu2 %v523_v10 }
 0x1a9   :  { %546 = vmatpush.msrb.mxu2 %v522_v13 }
 0x1ab   :  { %547 = vmatpush.msrb.mxu2 %v521_v16 }
 0x1ad   :  { %548 = vmatpush.msrb.mxu2 %v520_v19 }
 0x1af   :  { %549 = vmatpush.msrb.mxu2 %v519_v22 }
 0x1b1   :  { %550 = vmatpush.msrb.mxu2 %v518_v24 }
 0x1b3   :  { %551 = vmatpush.msrb.mxu2 %v517_v25 }
 0x1b4   :  { %617 = vmatmul.msk.f32.vlgmr.msrb.gmra.mxu2 %vm532_vm3, %v525_v26 }
 0x237   :  { %v553_v28 = vpop.f32.mrf.mxu2 }
 0x238   :  { %v554_v29 = vadd.f32 %v553_v28, %v530_v27 }
 0x23a   :  { %556 = vst [vmem:[%s975_s11] sm:$0xf] %v554_v29 }

</bundles_post_ra>
